<compile_context>
chip_gen: v7x
topology: tpu7x:2x2x1
jax: 0.10.0
libtpu: 0.0.40
codegen_flags: <defaults>
</compile_context>

<pallas_src>
import jax
import jax.numpy as jnp
from jax.experimental import pallas as pl
from jax.experimental.pallas import tpu as pltpu


def critic_kernel(cur_step_ref, w_ref, out_ref):
    # cur_step_ref: (B,)      int32   SMEM
    # w_ref:        (in_dim,) float32 SMEM   (nn.Linear weight row, flattened)
    # out_ref:      (B,)      float32 SMEM
    B = out_ref.shape[0]
    in_dim = w_ref.shape[0]
    # Static Python unroll: B is tiny (4), all work stays on the scalar unit.
    for b in range(B):
        idx = cur_step_ref[b]
        # TODO(synk): torch.nn.functional.one_hot raises on cur_step outside
        # [0, input_dim); here we clamp instead (prevents an unchecked OOB
        # SMEM read) -- semantic divergence only for invalid inputs.
        idx = jnp.clip(idx, 0, in_dim - 1)
        out_ref[b] = w_ref[idx]


@jax.jit
def critic_network_forward(cur_step, weight):
    """cur_step: (B,) integer step indices; weight: (1, input_dim) nn.Linear weight."""
    B = cur_step.shape[0]
    out_dim, in_dim = weight.shape
    assert out_dim == 1, "CriticNetwork linear has a single output unit"

    # Dtype/layout massaging stays under this jit so it fuses with the call.
    cs = cur_step.reshape(B).astype(jnp.int32)
    w = weight.reshape(in_dim).astype(jnp.float32)

    value = pl.pallas_call(
        critic_kernel,
        out_shape=jax.ShapeDtypeStruct((B,), jnp.float32),
        in_specs=[
            pl.BlockSpec(memory_space=pltpu.MemorySpace.SMEM),  # cur_step (B,)
            pl.BlockSpec(memory_space=pltpu.MemorySpace.SMEM),  # weight (in_dim,)
        ],
        out_specs=pl.BlockSpec(memory_space=pltpu.MemorySpace.SMEM),
        cost_estimate=pl.CostEstimate(
            flops=2 * B * in_dim,
            bytes_accessed=4 * (B + in_dim + B),
            transcendentals=0,
        ),
    )(cs, w)
    return value.reshape(B, 1)


if __name__ == "__main__":
    key = jax.random.PRNGKey(0)
    k1, k2 = jax.random.split(key)

    B = 4
    input_dim = 32

    # obs['cur_step'] (synthetic, deterministic)
    cur_step = jax.random.randint(k1, (B,), 0, input_dim, dtype=jnp.int32)

    # Case 1: module as constructed (weight.fill_(0.0)) -> value is all zeros.
    w_zero = jnp.zeros((1, input_dim), dtype=jnp.float32)
    v0 = jax.block_until_ready(critic_network_forward(cur_step, w_zero))
    assert v0.shape == (B, 1)
    assert bool(jnp.all(v0 == 0.0))

    # Case 2: nonzero weight -> verify gather semantics against a JAX reference.
    w_rand = jax.random.normal(k2, (1, input_dim), dtype=jnp.float32)
    v1 = jax.block_until_ready(critic_network_forward(cur_step, w_rand))
    ref = w_rand[0, cur_step].reshape(B, 1)  # one_hot @ W.T == row gather
    assert bool(jnp.all(jnp.abs(v1 - ref) < 1e-6))

    print("KERNEL_OK")
</pallas_src>

<mosaic_0001>
module attributes {stable_mosaic.version = 11 : i64} {
  func.func @critic_kernel(%arg0: memref<4xi32, #tpu.memory_space<smem>>, %arg1: memref<32xf32, #tpu.memory_space<smem>>, %arg2: memref<4xf32, #tpu.memory_space<smem>>) attributes {dimension_semantics = [], scalar_prefetch = 0 : i64, scratch_operands = 0 : i64, tpu.core_type = #tpu.core_type<tc>} {
    %c0 = arith.constant 0 : index
    %0 = memref.load %arg0[%c0] : memref<4xi32, #tpu.memory_space<smem>>
    %c0_i32 = arith.constant 0 : i32
    %c31_i32 = arith.constant 31 : i32
    %1 = arith.maxsi %c0_i32, %0 : i32
    %2 = arith.minsi %c31_i32, %1 : i32
    %3 = arith.index_cast %2 : i32 to index
    %4 = memref.load %arg1[%3] : memref<32xf32, #tpu.memory_space<smem>>
    %c0_0 = arith.constant 0 : index
    %5 = memref.load %arg2[%c0_0] : memref<4xf32, #tpu.memory_space<smem>>
    memref.store %4, %arg2[%c0_0] : memref<4xf32, #tpu.memory_space<smem>>
    %c1 = arith.constant 1 : index
    %6 = memref.load %arg0[%c1] : memref<4xi32, #tpu.memory_space<smem>>
    %c0_i32_1 = arith.constant 0 : i32
    %c31_i32_2 = arith.constant 31 : i32
    %7 = arith.maxsi %c0_i32_1, %6 : i32
    %8 = arith.minsi %c31_i32_2, %7 : i32
    %9 = arith.index_cast %8 : i32 to index
    %10 = memref.load %arg1[%9] : memref<32xf32, #tpu.memory_space<smem>>
    %c1_3 = arith.constant 1 : index
    %11 = memref.load %arg2[%c1_3] : memref<4xf32, #tpu.memory_space<smem>>
    memref.store %10, %arg2[%c1_3] : memref<4xf32, #tpu.memory_space<smem>>
    %c2 = arith.constant 2 : index
    %12 = memref.load %arg0[%c2] : memref<4xi32, #tpu.memory_space<smem>>
    %c0_i32_4 = arith.constant 0 : i32
    %c31_i32_5 = arith.constant 31 : i32
    %13 = arith.maxsi %c0_i32_4, %12 : i32
    %14 = arith.minsi %c31_i32_5, %13 : i32
    %15 = arith.index_cast %14 : i32 to index
    %16 = memref.load %arg1[%15] : memref<32xf32, #tpu.memory_space<smem>>
    %c2_6 = arith.constant 2 : index
    %17 = memref.load %arg2[%c2_6] : memref<4xf32, #tpu.memory_space<smem>>
    memref.store %16, %arg2[%c2_6] : memref<4xf32, #tpu.memory_space<smem>>
    %c3 = arith.constant 3 : index
    %18 = memref.load %arg0[%c3] : memref<4xi32, #tpu.memory_space<smem>>
    %c0_i32_7 = arith.constant 0 : i32
    %c31_i32_8 = arith.constant 31 : i32
    %19 = arith.maxsi %c0_i32_7, %18 : i32
    %20 = arith.minsi %c31_i32_8, %19 : i32
    %21 = arith.index_cast %20 : i32 to index
    %22 = memref.load %arg1[%21] : memref<32xf32, #tpu.memory_space<smem>>
    %c3_9 = arith.constant 3 : index
    %23 = memref.load %arg2[%c3_9] : memref<4xf32, #tpu.memory_space<smem>>
    memref.store %22, %arg2[%c3_9] : memref<4xf32, #tpu.memory_space<smem>>
    return
  }
}

</mosaic_0001>

<bundles_post_ra>
// kernel: critic_network_forward.1
= control target key start
LH: loop header
LB: loop body
LE: loop exit
PB: predicated region body
PF: predicated region fallthrough
CT: control target
= control target key end

     0   :  { %7 = vsyncpa [#allocation4], 0  ;;  %s194_s0 = inlined_call_operand.vmem [shape: s32[4], index: 0, kind: input, shape index: {}]   ;;  %s195_s1 = inlined_call_operand.vmem [shape: f32[32], index: 1, kind: input, shape index: {}]   ;;  %s196_s2 = inlined_call_operand.hbm [shape: f32[4], index: 2, kind: output, shape index: {}]  }
   0x1   :  { %8 = vsyncpa [#allocation6], 0 }
   0x2   :  { %9 = vsyncpa [#allocation3], 0  ;;  %s16_s11 = sshll.u32 %s194_s0, 4  ;;  %s26_s14 = sshll.u32 %s195_s1, 4  ;;  %s17_s11 = int_to_ptr.vmem [resolvable:$true] %s16_s11  ;;  %s27_s14 = int_to_ptr.vmem [resolvable:$true] %s26_s14 }
   0x3   :  { %s118_s15 = scalar_lea.vmem %s17_s11, 16  ;;  %p123_p1 = scmp.lt.s32.totalorder %s17_s11, %s17_s11 }
   0x4   :  { %p119_p0 = scmp.ne.s32.totalorder %s17_s11, %s118_s15  ;;  %p124_p2 = scmp.lt.s32.totalorder %s118_s15, %s118_s15 }
   0x6   :  { %p125_p3 = por %p124_p2, %p123_p1 }
   0x8   :  { %p126_p4 = pnand %p125_p3, %p119_p0 }
   0xa   :  { %129 = shalt.err (!%p126_p4)
}
   0xb   :  { %s158_s16 = smov [#allocation2]   ;;  %s130_s17 = scalar_lea.vmem %s27_s14, 16 }
   0xc   :  { %19 = dma.vmem_to_smem %s17_s11, 16, %s158_s16, [#allocation4]  }
   0xd   :  { %p131_p5 = scmp.ne.s32.totalorder %s27_s14, %s130_s17  ;;  %p135_p6 = scmp.lt.s32.totalorder %s27_s14, %s27_s14 }
   0xe   :  { %p136_p7 = scmp.lt.s32.totalorder %s130_s17, %s130_s17 }
  0x10   :  { %p137_p8 = por %p136_p7, %p135_p6 }
  0x12   :  { %p138_p9 = pnand %p137_p8, %p131_p5 }
  0x14   :  { %141 = shalt.err (!%p138_p9)
}
  0x15   :  { %s159_s0 = smov [#allocation5]  }
  0x16   :  { %29 = dma.vmem_to_smem %s27_s14, 16, %s159_s0, [#allocation6]  }
  0x17   :  { %152 = dma.done.wait [#allocation4], 16  }
  0x18   :  { %153 = vsyncadd [#allocation4], 4294967280 }
  0x19   :  { %154 = dma.done.wait [#allocation6], 16  }
  0x1a   :  { %155 = vsyncadd [#allocation6], 4294967280 }
  0x1b   :  { %36 = sfence }
  0x1c   :  { %s37_s1 = sld [smem:[#allocation2]]  ;;  %s89_s18 = sld [smem:[#allocation2 + $0x1]] }
  0x1d   :  { %s95_s19 = sld [smem:[#allocation2 + $0x2]]  ;;  %s101_s20 = sld [smem:[#allocation2 + $0x3]] }
  0x1e   :  { %s142_s27 = scalar_lea.hbm %s196_s2, 16 }
  0x1f   :  { %p143_p4 = scmp.ne.s32.totalorder %s196_s2, %s142_s27  ;;  %p146_p5 = scmp.lt.u32.totalorder %s142_s27, %s196_s2 }
  0x21   :  { %p148_p6 = pnand %p146_p5, %p143_p4 }
  0x22   :  { %p38_p10 = scmp.gt.s32.totalorder %s37_s1, 0  ;;  %p84_p11 = scmp.lt.s32.totalorder %s37_s1, 31 }
  0x23   :  { %p46_p12 = scmp.gt.s32.totalorder %s89_s18, 0  ;;  %p90_p13 = scmp.lt.s32.totalorder %s89_s18, 31 }
  0x24   :  { %s198_s1 = smov (!%p38_p10, %s37_s1), 0  ;;  %p54_p0 = scmp.gt.s32.totalorder %s95_s19, 0 }
  0x25   :  { %s200_s18 = smov (!%p46_p12, %s89_s18), 0  ;;  %s202_s1 = smov (!%p84_p11, %s198_s1), 31 }
  0x26   :  { %s204_s18 = smov (!%p90_p13, %s200_s18), 31  ;;  %s42_s21 = sld [smem:[#allocation5 + %s202_s1]] }
  0x27   :  { %s50_s22 = sld [smem:[#allocation5 + %s204_s18]]  ;;  %p96_p1 = scmp.lt.s32.totalorder %s95_s19, 31 }
  0x28   :  { %s206_s19 = smov (!%p54_p0, %s95_s19), 0  ;;  %p62_p2 = scmp.gt.s32.totalorder %s101_s20, 0 }
  0x29   :  { %p102_p3 = scmp.lt.s32.totalorder %s101_s20, 31  ;;  %s208_s19 = smov (!%p96_p1, %s206_s19), 31 }
  0x2a   :  { %s210_s20 = smov (!%p62_p2, %s101_s20), 0  ;;  %s58_s23 = sld [smem:[#allocation5 + %s208_s19]] }
  0x2b   :  { %s212_s20 = smov (!%p102_p3, %s210_s20), 31 }
  0x2c   :  { %44 = sst [smem:[#allocation7]] %s42_s21 }
  0x2d   :  { %52 = sst [smem:[#allocation7 + $0x1]] %s50_s22 }
  0x2e   :  { %s66_s24 = sld [smem:[#allocation5 + %s212_s20]] }
  0x30   :  { %60 = sst [smem:[#allocation7 + $0x2]] %s58_s23 }
  0x34   :  { %68 = sst [smem:[#allocation7 + $0x3]] %s66_s24 }
  0x35   :  { %151 = shalt.err (!%p148_p6)
}
  0x36   :  { %s160_s4 = smov [#allocation7]  }
  0x37   :  { %76 = dma.smem_to_hbm %s160_s4, 16, %s196_s2, [#allocation3]  }
  0x38   :  { %156 = dma.done.wait [#allocation3], 16  }
  0x39   :  { %157 = vsyncadd [#allocation3], 4294967280 }
  0x3a   :  { %80 = sfence }
  0x3b   :  { %81 = vsyncpa [#allocation3], 1 }
  0x3c   :  { %82 = vsyncpa [#allocation4], 1 }
  0x3d   :  { %83 = vsyncpa [#allocation6], 1 }

</bundles_post_ra>
